<compile_context>
chip_gen: v7x
topology: tpu7x:2x2x1
jax: 0.10.0
libtpu: 0.0.40
codegen_flags: <defaults>
</compile_context>

<pallas_src>
import math

import jax
import jax.numpy as jnp
from jax import lax
from jax.experimental import pallas as pl
from jax.experimental.pallas import tpu as pltpu


def _round_up(n, m):
    return ((n + m - 1) // m) * m


# ----------------------------------------------------------------------------
# Pallas kernel: one LSTM layer, time axis tiled through the grid.
#   x_ref  : (Tt*Bp, I)   flattened time-tile of the input
#   wih_ref: (I, 4Hp)     pre-transposed / prescaled / gate-padded
#   whh_ref: (Hp, 4Hp)
#   b_ref  : (1, 4Hp)     combined, prescaled, gate-padded bias
#   h0/c0  : (Bp, Hp)     initial state (resident)
#   y_ref  : (Tt*Bp, Hp)  flattened time-tile of the output
#   hT/cT  : (Bp, Hp)     final state (resident, constant index map)
#   gx_ref : (Tt*Bp,4Hp)  f32 scratch for the hoisted input projection
#   h_scr/c_scr : (Bp,Hp) f32 scratch — state carried across grid steps
# ----------------------------------------------------------------------------
def lstm_layer_kernel(x_ref, wih_ref, whh_ref, b_ref, h0_ref, c0_ref,
                      y_ref, hT_ref, cT_ref, gx_ref, h_scr, c_scr):
    Bp, Hp = h0_ref.shape
    tt = x_ref.shape[0] // Bp

    @pl.when(pl.program_id(0) == 0)
    def _init():
        h_scr[...] = h0_ref[...].astype(jnp.float32)
        c_scr[...] = c0_ref[...].astype(jnp.float32)

    # Hoisted input projection: one big MXU matmul for the whole time tile.
    gx_ref[...] = (
        jnp.dot(x_ref[...].astype(wih_ref.dtype), wih_ref[...],
                preferred_element_type=jnp.float32)
        + b_ref[...].astype(jnp.float32))

    def step(t, carry):
        h, c = carry
        r = pl.multiple_of(t * Bp, Bp)                       # sublane-aligned
        gates = gx_ref[pl.ds(r, Bp), :] + jnp.dot(
            h.astype(whh_ref.dtype), whh_ref[...],
            preferred_element_type=jnp.float32)              # (Bp, 4Hp)
        # One full-width EUP pass over all 4 gates. Sigmoid gates were
        # prescaled by 0.5 in W/b so sigmoid(x) = 0.5 + 0.5*tanh(x/2).
        tg = jnp.tanh(gates)
        i_g = 0.5 * tg[:, 0 * Hp:1 * Hp] + 0.5
        f_g = 0.5 * tg[:, 1 * Hp:2 * Hp] + 0.5
        g_g = tg[:, 2 * Hp:3 * Hp]
        o_g = 0.5 * tg[:, 3 * Hp:4 * Hp] + 0.5
        c_new = f_g * c + i_g * g_g
        h_new = o_g * jnp.tanh(c_new)
        y_ref[pl.ds(r, Bp), :] = h_new.astype(y_ref.dtype)   # lane-dense store
        return h_new, c_new

    h, c = lax.fori_loop(0, tt, step, (h_scr[...], c_scr[...]), unroll=True)
    h_scr[...] = h
    c_scr[...] = c
    hT_ref[...] = h.astype(hT_ref.dtype)
    cT_ref[...] = c.astype(cT_ref.dtype)


def run_lstm_layer(x2, wih, whh, b, h0, c0, *, time_tile=16):
    """One LSTM layer.

    x2 : (T*Bp, I)  flattened time-major input (Bp = padded batch)
    wih: (I, 4Hp)   whh: (Hp, 4Hp)   b: (1, 4Hp)
    h0, c0: (Bp, Hp)
    returns y2 (T*Bp, Hp), h_T (Bp, Hp), c_T (Bp, Hp)
    """
    Bp, Hp = h0.shape
    TB, I = x2.shape
    T = TB // Bp
    G = 4 * Hp

    tt = max(1, min(time_tile, T))
    while T % tt:
        tt -= 1
    n_t = T // tt

    out_shape = (
        jax.ShapeDtypeStruct((TB, Hp), x2.dtype),
        jax.ShapeDtypeStruct((Bp, Hp), jnp.float32),
        jax.ShapeDtypeStruct((Bp, Hp), jnp.float32),
    )
    return pl.pallas_call(
        lstm_layer_kernel,
        out_shape=out_shape,
        grid_spec=pltpu.PrefetchScalarGridSpec(
            num_scalar_prefetch=0,
            grid=(n_t,),
            in_specs=[
                pl.BlockSpec((tt * Bp, I), lambda t: (t, 0)),   # x tile (pipelined)
                pl.BlockSpec((I, G), lambda t: (0, 0)),         # weights resident
                pl.BlockSpec((Hp, G), lambda t: (0, 0)),
                pl.BlockSpec((1, G), lambda t: (0, 0)),
                pl.BlockSpec((Bp, Hp), lambda t: (0, 0)),
                pl.BlockSpec((Bp, Hp), lambda t: (0, 0)),
            ],
            out_specs=(
                pl.BlockSpec((tt * Bp, Hp), lambda t: (t, 0)),  # y tile (pipelined)
                pl.BlockSpec((Bp, Hp), lambda t: (0, 0)),
                pl.BlockSpec((Bp, Hp), lambda t: (0, 0)),
            ),
            scratch_shapes=[
                pltpu.VMEM((tt * Bp, G), jnp.float32),  # hoisted input projection
                pltpu.VMEM((Bp, Hp), jnp.float32),      # h carry
                pltpu.VMEM((Bp, Hp), jnp.float32),      # c carry
            ],
        ),
        compiler_params=pltpu.CompilerParams(
            dimension_semantics=("arbitrary",)),  # time axis carries state
    )(x2, wih, whh, b, h0, c0)
    # TODO(synk): on v7x, add a leading "parallel" grid axis over batch tiles
    # (2 TensorCores) and set vmem_limit_bytes when re-deriving tile sizes.


# ----------------------------------------------------------------------------
# ModularRNN wrapper: stacks layers, threads output, pads/aligns layouts.
# ----------------------------------------------------------------------------
def _pad_gate_cols(w, H, Hp):
    """(rows, 4H) -> (rows, 4Hp): pad each gate column-block to Hp lanes."""
    if Hp == H:
        return w
    blocks = [jnp.pad(w[:, k * H:(k + 1) * H], ((0, 0), (0, Hp - H)))
              for k in range(4)]
    return jnp.concatenate(blocks, axis=1)


class ModularRNNPallas:
    def __init__(self, num_layers, input_size, hidden_size, dropout, key,
                 param_dtype=jnp.float32):
        assert dropout == 0.0, "dropout disabled for deterministic inference"
        # TODO(synk): training-mode dropout between layers not implemented.
        self.num_layers = num_layers
        self.hidden_size = hidden_size
        self.hidden_pad = _round_up(hidden_size, 128)   # lane-aligned hidden
        self.param_dtype = param_dtype
        self.raw_params = []       # original-layout weights (reference check)
        self.kernel_params = []    # transposed / prescaled / padded weights
        H, Hp = hidden_size, self.hidden_pad
        bound = 1.0 / math.sqrt(hidden_size)
        # sigmoid(x) = 0.5 + 0.5*tanh(x/2): fold the 0.5 prescale into the
        # i/f/o gate rows of W and b; g-gate rows stay unscaled (plain tanh).
        scale = jnp.concatenate([jnp.full((H,), 0.5), jnp.full((H,), 0.5),
                                 jnp.ones((H,)), jnp.full((H,), 0.5)])
        for layer_idx in range(num_layers):
            in_sz = input_size if layer_idx == 0 else hidden_size
            key, k1, k2, k3, k4 = jax.random.split(key, 5)
            w_ih = jax.random.uniform(k1, (4 * H, in_sz), jnp.float32,
                                      -bound, bound)
            w_hh = jax.random.uniform(k2, (4 * H, H), jnp.float32,
                                      -bound, bound)
            b_ih = jax.random.uniform(k3, (4 * H,), jnp.float32, -bound, bound)
            b_hh = jax.random.uniform(k4, (4 * H,), jnp.float32, -bound, bound)
            self.raw_params.append(dict(w_ih=w_ih, w_hh=w_hh, b=b_ih + b_hh))

            wih_t = (w_ih * scale[:, None]).T               # (in_sz, 4H)
            whh_t = (w_hh * scale[:, None]).T               # (H, 4H)
            b_s = (b_ih + b_hh) * scale                     # (4H,)

            wih_p = _pad_gate_cols(wih_t, H, Hp)            # (in_sz, 4Hp)
            if layer_idx > 0:                               # rows take padded Hp input
                wih_p = jnp.pad(wih_p, ((0, Hp - in_sz), (0, 0)))
            whh_p = _pad_gate_cols(whh_t, H, Hp)            # (H, 4Hp)
            whh_p = jnp.pad(whh_p, ((0, Hp - H), (0, 0)))   # (Hp, 4Hp)
            b_p = _pad_gate_cols(b_s[None, :], H, Hp)       # (1, 4Hp)

            self.kernel_params.append(dict(
                wih=wih_p.astype(param_dtype),
                whh=whh_p.astype(param_dtype),
                b=b_p.astype(jnp.float32)))

    def get_zero_state(self, batch_size):
        z = jnp.zeros((batch_size, self.hidden_size), jnp.float32)
        return [(z, z) for _ in range(self.num_layers)]

    def __call__(self, inp, states, *, time_tile=16):
        # inp: (T, B, input_size), time-major (batch_first=False)
        T, B, _ = inp.shape
        Bp = _round_up(max(B, 8), 8)                 # sublane-aligned batch
        H, Hp = self.hidden_size, self.hidden_pad
        xp = jnp.pad(inp, ((0, 0), (0, Bp - B), (0, 0)))
        x2 = xp.reshape(T * Bp, -1)                  # flattened lane-dense layout
        output_states = []
        for i, p in enumerate(self.kernel_params):
            h0, c0 = states[i]
            h0p = jnp.pad(h0.astype(jnp.float32), ((0, Bp - B), (0, Hp - H)))
            c0p = jnp.pad(c0.astype(jnp.float32), ((0, Bp - B), (0, Hp - H)))
            x2, h_t, c_t = run_lstm_layer(x2, p["wih"], p["whh"], p["b"],
                                          h0p, c0p, time_tile=time_tile)
            output_states.append((h_t[:B, :H], c_t[:B, :H]))
            # TODO(synk): fuse adjacent layers into one pallas_call to keep the
            # intermediate (Tt,B,H) activation in VMEM (v6e) / cut launch cost.
        y = x2.reshape(T, Bp, Hp)[:, :B, :H]
        return y, output_states


# ----------------------------------------------------------------------------
# Pure-JAX reference (original semantics: unscaled, unpadded weights).
# ----------------------------------------------------------------------------
def lstm_layer_ref(x, w_ih, w_hh, b, h0, c0):
    H = h0.shape[1]
    wih_t, whh_t = w_ih.T, w_hh.T

    def step(carry, x_t):
        h, c = carry
        gates = x_t @ wih_t + h @ whh_t + b
        i_g = jax.nn.sigmoid(gates[:, 0 * H:1 * H])
        f_g = jax.nn.sigmoid(gates[:, 1 * H:2 * H])
        g_g = jnp.tanh(gates[:, 2 * H:3 * H])
        o_g = jax.nn.sigmoid(gates[:, 3 * H:4 * H])
        c_new = f_g * c + i_g * g_g
        h_new = o_g * jnp.tanh(c_new)
        return (h_new, c_new), h_new

    (h, c), ys = lax.scan(step, (h0, c0), x)
    return ys, h, c


if __name__ == "__main__":
    SEQ, BATCH, INPUT, HIDDEN, NUM_LAYERS = 8, 4, 16, 32, 2

    key = jax.random.PRNGKey(0)
    kx, kmodel = jax.random.split(key)
    x = jax.random.normal(kx, (SEQ, BATCH, INPUT), jnp.float32)

    model = ModularRNNPallas(NUM_LAYERS, INPUT, HIDDEN, dropout=0.0, key=kmodel)
    states = model.get_zero_state(BATCH)

    # time_tile=4 -> grid=(2,): exercises the h/c carry across grid steps.
    out, out_states = model(x, states, time_tile=4)
    out = jax.block_until_ready(out)

    # Reference check (plain JAX, original weights / semantics).
    ref = x
    ref_states = []
    for i, p in enumerate(model.raw_params):
        h0, c0 = states[i]
        ref, h_r, c_r = lstm_layer_ref(ref, p["w_ih"], p["w_hh"], p["b"],
                                       h0, c0)
        ref_states.append((h_r, c_r))

    assert jnp.allclose(out, ref, atol=1e-4, rtol=1e-4), "output mismatch"
    for (h_k, c_k), (h_r, c_r) in zip(out_states, ref_states):
        assert jnp.allclose(h_k, h_r, atol=1e-4, rtol=1e-4), "h_T mismatch"
        assert jnp.allclose(c_k, c_r, atol=1e-4, rtol=1e-4), "c_T mismatch"

    # Optional bf16-weight path (f32 accumulation + f32 state carry).
    model_bf16 = ModularRNNPallas(NUM_LAYERS, INPUT, HIDDEN, dropout=0.0,
                                  key=kmodel, param_dtype=jnp.bfloat16)
    out_bf16, _ = model_bf16(x, states, time_tile=4)
    out_bf16 = jax.block_until_ready(out_bf16)
    assert float(jnp.max(jnp.abs(out_bf16.astype(jnp.float32) - ref))) < 0.1

    print("KERNEL_OK")
</pallas_src>

<mosaic_0001>
module attributes {stable_mosaic.version = 11 : i64} {
  func.func @lstm_layer_kernel(%arg0: i32, %arg1: memref<32x16xf32, #tpu.memory_space<vmem>>, %arg2: memref<16x512xf32, #tpu.memory_space<vmem>>, %arg3: memref<128x512xf32, #tpu.memory_space<vmem>>, %arg4: memref<1x512xf32, #tpu.memory_space<vmem>>, %arg5: memref<8x128xf32, #tpu.memory_space<vmem>>, %arg6: memref<8x128xf32, #tpu.memory_space<vmem>>, %arg7: memref<32x128xf32, #tpu.memory_space<vmem>>, %arg8: memref<8x128xf32, #tpu.memory_space<vmem>>, %arg9: memref<8x128xf32, #tpu.memory_space<vmem>>, %arg10: memref<32x512xf32, #tpu.memory_space<vmem>>, %arg11: memref<8x128xf32, #tpu.memory_space<vmem>>, %arg12: memref<8x128xf32, #tpu.memory_space<vmem>>) attributes {dimension_semantics = [#tpu.dimension_semantics<arbitrary>], iteration_bounds = array<i64: 2>, scalar_prefetch = 0 : i64, scratch_operands = 3 : i64, tpu.core_type = #tpu.core_type<tc>, window_params = [{transform_indices = @transform_0, window_bounds = array<i64: 32, 16>}, {pipeline_mode = #tpu.pipeline_mode<synchronous>, transform_indices = @transform_1, window_bounds = array<i64: 16, 512>}, {pipeline_mode = #tpu.pipeline_mode<synchronous>, transform_indices = @transform_2, window_bounds = array<i64: 128, 512>}, {pipeline_mode = #tpu.pipeline_mode<synchronous>, transform_indices = @transform_3, window_bounds = array<i64: 1, 512>}, {pipeline_mode = #tpu.pipeline_mode<synchronous>, transform_indices = @transform_4, window_bounds = array<i64: 8, 128>}, {pipeline_mode = #tpu.pipeline_mode<synchronous>, transform_indices = @transform_5, window_bounds = array<i64: 8, 128>}, {transform_indices = @transform_6, window_bounds = array<i64: 32, 128>}, {pipeline_mode = #tpu.pipeline_mode<synchronous>, transform_indices = @transform_7, window_bounds = array<i64: 8, 128>}, {pipeline_mode = #tpu.pipeline_mode<synchronous>, transform_indices = @transform_8, window_bounds = array<i64: 8, 128>}]} {
    %c0_i32 = arith.constant 0 : i32
    %0 = arith.cmpi eq, %arg0, %c0_i32 : i32
    %1 = arith.extui %0 : i1 to i32
    %c0_i32_0 = arith.constant 0 : i32
    %2 = arith.cmpi ne, %1, %c0_i32_0 : i32
    scf.if %2 {
      %c0_68 = arith.constant 0 : index
      %c0_69 = arith.constant 0 : index
      %140 = vector.load %arg5[%c0_68, %c0_69] : memref<8x128xf32, #tpu.memory_space<vmem>>, vector<8x128xf32>
      %c0_70 = arith.constant 0 : index
      %c0_71 = arith.constant 0 : index
      %141 = vector.load %arg11[%c0_70, %c0_71] : memref<8x128xf32, #tpu.memory_space<vmem>>, vector<8x128xf32>
      tpu.vector_store %arg11[%c0_70, %c0_71], %140 {strides = array<i32>} : memref<8x128xf32, #tpu.memory_space<vmem>>, vector<8x128xf32>,
      %c0_72 = arith.constant 0 : index
      %c0_73 = arith.constant 0 : index
      %142 = vector.load %arg6[%c0_72, %c0_73] : memref<8x128xf32, #tpu.memory_space<vmem>>, vector<8x128xf32>
      %c0_74 = arith.constant 0 : index
      %c0_75 = arith.constant 0 : index
      %143 = vector.load %arg12[%c0_74, %c0_75] : memref<8x128xf32, #tpu.memory_space<vmem>>, vector<8x128xf32>
      tpu.vector_store %arg12[%c0_74, %c0_75], %142 {strides = array<i32>} : memref<8x128xf32, #tpu.memory_space<vmem>>, vector<8x128xf32>,
    } else {
    }
    %c0 = arith.constant 0 : index
    %c0_1 = arith.constant 0 : index
    %3 = vector.load %arg1[%c0, %c0_1] : memref<32x16xf32, #tpu.memory_space<vmem>>, vector<32x16xf32>
    %c0_2 = arith.constant 0 : index
    %c0_3 = arith.constant 0 : index
    %4 = vector.load %arg2[%c0_2, %c0_3] : memref<16x512xf32, #tpu.memory_space<vmem>>, vector<16x512xf32>
    %cst = arith.constant dense<0.000000e+00> : vector<32x512xf32>
    %5 = tpu.matmul %3, %4, %cst {dimension_numbers = #tpu.dot_dimension_numbers<[1], [0], [0], [1], [0, 0, 1, 1], [], []>} : vector<32x16xf32>, vector<16x512xf32>, vector<32x512xf32> -> vector<32x512xf32>
    %c0_4 = arith.constant 0 : index
    %c0_5 = arith.constant 0 : index
    %6 = vector.load %arg4[%c0_4, %c0_5] : memref<1x512xf32, #tpu.memory_space<vmem>>, vector<1x512xf32>
    %7 = vector.broadcast %6 : vector<1x512xf32> to vector<32x512xf32>
    %8 = arith.addf %5, %7 : vector<32x512xf32>
    %c0_6 = arith.constant 0 : index
    %c0_7 = arith.constant 0 : index
    %9 = vector.load %arg10[%c0_6, %c0_7] : memref<32x512xf32, #tpu.memory_space<vmem>>, vector<32x512xf32>
    tpu.vector_store %arg10[%c0_6, %c0_7], %8 {strides = array<i32>} : memref<32x512xf32, #tpu.memory_space<vmem>>, vector<32x512xf32>,
    %c0_8 = arith.constant 0 : index
    %c0_9 = arith.constant 0 : index
    %10 = vector.load %arg11[%c0_8, %c0_9] : memref<8x128xf32, #tpu.memory_space<vmem>>, vector<8x128xf32>
    %c0_10 = arith.constant 0 : index
    %c0_11 = arith.constant 0 : index
    %11 = vector.load %arg12[%c0_10, %c0_11] : memref<8x128xf32, #tpu.memory_space<vmem>>, vector<8x128xf32>
    %c0_i32_12 = arith.constant 0 : i32
    %c8_i32 = arith.constant 8 : i32
    %12 = arith.muli %c0_i32_12, %c8_i32 : i32
    %13 = tpu.assume_multiple %12, 8 : i32
    %14 = arith.index_cast %13 : i32 to index
    %c0_13 = arith.constant 0 : index
    %15 = vector.load %arg10[%14, %c0_13] : memref<32x512xf32, #tpu.memory_space<vmem>>, vector<8x512xf32>
    %c0_14 = arith.constant 0 : index
    %c0_15 = arith.constant 0 : index
    %16 = vector.load %arg3[%c0_14, %c0_15] : memref<128x512xf32, #tpu.memory_space<vmem>>, vector<128x512xf32>
    %cst_16 = arith.constant dense<0.000000e+00> : vector<8x512xf32>
    %17 = tpu.matmul %10, %16, %cst_16 {dimension_numbers = #tpu.dot_dimension_numbers<[1], [0], [0], [1], [0, 0, 1, 1], [], []>} : vector<8x128xf32>, vector<128x512xf32>, vector<8x512xf32> -> vector<8x512xf32>
    %18 = arith.addf %15, %17 : vector<8x512xf32>
    %19 = math.tanh %18 : vector<8x512xf32>
    %20 = vector.extract_strided_slice %19 {offsets = [0, 0], sizes = [8, 128], strides = [1, 1]} : vector<8x512xf32> to vector<8x128xf32>
    %cst_17 = arith.constant 5.000000e-01 : f32
    %21 = vector.broadcast %cst_17 : f32 to vector<8x128xf32>
    %22 = arith.mulf %21, %20 : vector<8x128xf32>
    %cst_18 = arith.constant 5.000000e-01 : f32
    %23 = vector.broadcast %cst_18 : f32 to vector<8x128xf32>
    %24 = arith.addf %22, %23 : vector<8x128xf32>
    %25 = vector.extract_strided_slice %19 {offsets = [0, 128], sizes = [8, 128], strides = [1, 1]} : vector<8x512xf32> to vector<8x128xf32>
    %cst_19 = arith.constant 5.000000e-01 : f32
    %26 = vector.broadcast %cst_19 : f32 to vector<8x128xf32>
    %27 = arith.mulf %26, %25 : vector<8x128xf32>
    %cst_20 = arith.constant 5.000000e-01 : f32
    %28 = vector.broadcast %cst_20 : f32 to vector<8x128xf32>
    %29 = arith.addf %27, %28 : vector<8x128xf32>
    %30 = vector.extract_strided_slice %19 {offsets = [0, 256], sizes = [8, 128], strides = [1, 1]} : vector<8x512xf32> to vector<8x128xf32>
    %31 = vector.extract_strided_slice %19 {offsets = [0, 384], sizes = [8, 128], strides = [1, 1]} : vector<8x512xf32> to vector<8x128xf32>
    %cst_21 = arith.constant 5.000000e-01 : f32
    %32 = vector.broadcast %cst_21 : f32 to vector<8x128xf32>
    %33 = arith.mulf %32, %31 : vector<8x128xf32>
    %cst_22 = arith.constant 5.000000e-01 : f32
    %34 = vector.broadcast %cst_22 : f32 to vector<8x128xf32>
    %35 = arith.addf %33, %34 : vector<8x128xf32>
    %36 = arith.mulf %29, %11 : vector<8x128xf32>
    %37 = arith.mulf %24, %30 : vector<8x128xf32>
    %38 = arith.addf %36, %37 : vector<8x128xf32>
    %39 = math.tanh %38 : vector<8x128xf32>
    %40 = arith.mulf %35, %39 : vector<8x128xf32>
    %41 = arith.index_cast %13 : i32 to index
    %c0_23 = arith.constant 0 : index
    %42 = vector.load %arg7[%41, %c0_23] : memref<32x128xf32, #tpu.memory_space<vmem>>, vector<8x128xf32>
    tpu.vector_store %arg7[%41, %c0_23], %40 {strides = array<i32>} : memref<32x128xf32, #tpu.memory_space<vmem>>, vector<8x128xf32>,
    %c1_i32 = arith.constant 1 : i32
    %c8_i32_24 = arith.constant 8 : i32
    %43 = arith.muli %c1_i32, %c8_i32_24 : i32
    %44 = tpu.assume_multiple %43, 8 : i32
    %45 = arith.index_cast %44 : i32 to index
    %c0_25 = arith.constant 0 : index
    %46 = vector.load %arg10[%45, %c0_25] : memref<32x512xf32, #tpu.memory_space<vmem>>, vector<8x512xf32>
    %c0_26 = arith.constant 0 : index
    %c0_27 = arith.constant 0 : index
    %47 = vector.load %arg3[%c0_26, %c0_27] : memref<128x512xf32, #tpu.memory_space<vmem>>, vector<128x512xf32>
    %cst_28 = arith.constant dense<0.000000e+00> : vector<8x512xf32>
    %48 = tpu.matmul %40, %47, %cst_28 {dimension_numbers = #tpu.dot_dimension_numbers<[1], [0], [0], [1], [0, 0, 1, 1], [], []>} : vector<8x128xf32>, vector<128x512xf32>, vector<8x512xf32> -> vector<8x512xf32>
    %49 = arith.addf %46, %48 : vector<8x512xf32>
    %50 = math.tanh %49 : vector<8x512xf32>
    %51 = vector.extract_strided_slice %50 {offsets = [0, 0], sizes = [8, 128], strides = [1, 1]} : vector<8x512xf32> to vector<8x128xf32>
    %cst_29 = arith.constant 5.000000e-01 : f32
    %52 = vector.broadcast %cst_29 : f32 to vector<8x128xf32>
    %53 = arith.mulf %52, %51 : vector<8x128xf32>
    %cst_30 = arith.constant 5.000000e-01 : f32
    %54 = vector.broadcast %cst_30 : f32 to vector<8x128xf32>
    %55 = arith.addf %53, %54 : vector<8x128xf32>
    %56 = vector.extract_strided_slice %50 {offsets = [0, 128], sizes = [8, 128], strides = [1, 1]} : vector<8x512xf32> to vector<8x128xf32>
    %cst_31 = arith.constant 5.000000e-01 : f32
    %57 = vector.broadcast %cst_31 : f32 to vector<8x128xf32>
    %58 = arith.mulf %57, %56 : vector<8x128xf32>
    %cst_32 = arith.constant 5.000000e-01 : f32
    %59 = vector.broadcast %cst_32 : f32 to vector<8x128xf32>
    %60 = arith.addf %58, %59 : vector<8x128xf32>
    %61 = vector.extract_strided_slice %50 {offsets = [0, 256], sizes = [8, 128], strides = [1, 1]} : vector<8x512xf32> to vector<8x128xf32>
    %62 = vector.extract_strided_slice %50 {offsets = [0, 384], sizes = [8, 128], strides = [1, 1]} : vector<8x512xf32> to vector<8x128xf32>
    %cst_33 = arith.constant 5.000000e-01 : f32
    %63 = vector.broadcast %cst_33 : f32 to vector<8x128xf32>
    %64 = arith.mulf %63, %62 : vector<8x128xf32>
    %cst_34 = arith.constant 5.000000e-01 : f32
    %65 = vector.broadcast %cst_34 : f32 to vector<8x128xf32>
    %66 = arith.addf %64, %65 : vector<8x128xf32>
    %67 = arith.mulf %60, %38 : vector<8x128xf32>
    %68 = arith.mulf %55, %61 : vector<8x128xf32>
    %69 = arith.addf %67, %68 : vector<8x128xf32>
    %70 = math.tanh %69 : vector<8x128xf32>
    %71 = arith.mulf %66, %70 : vector<8x128xf32>
    %72 = arith.index_cast %44 : i32 to index
    %c0_35 = arith.constant 0 : index
    %73 = vector.load %arg7[%72, %c0_35] : memref<32x128xf32, #tpu.memory_space<vmem>>, vector<8x128xf32>
    tpu.vector_store %arg7[%72, %c0_35], %71 {strides = array<i32>} : memref<32x128xf32, #tpu.memory_space<vmem>>, vector<8x128xf32>,
    %c2_i32 = arith.constant 2 : i32
    %c8_i32_36 = arith.constant 8 : i32
    %74 = arith.muli %c2_i32, %c8_i32_36 : i32
    %75 = tpu.assume_multiple %74, 8 : i32
    %76 = arith.index_cast %75 : i32 to index
    %c0_37 = arith.constant 0 : index
    %77 = vector.load %arg10[%76, %c0_37] : memref<32x512xf32, #tpu.memory_space<vmem>>, vector<8x512xf32>
    %c0_38 = arith.constant 0 : index
    %c0_39 = arith.constant 0 : index
    %78 = vector.load %arg3[%c0_38, %c0_39] : memref<128x512xf32, #tpu.memory_space<vmem>>, vector<128x512xf32>
    %cst_40 = arith.constant dense<0.000000e+00> : vector<8x512xf32>
    %79 = tpu.matmul %71, %78, %cst_40 {dimension_numbers = #tpu.dot_dimension_numbers<[1], [0], [0], [1], [0, 0, 1, 1], [], []>} : vector<8x128xf32>, vector<128x512xf32>, vector<8x512xf32> -> vector<8x512xf32>
    %80 = arith.addf %77, %79 : vector<8x512xf32>
    %81 = math.tanh %80 : vector<8x512xf32>
    %82 = vector.extract_strided_slice %81 {offsets = [0, 0], sizes = [8, 128], strides = [1, 1]} : vector<8x512xf32> to vector<8x128xf32>
    %cst_41 = arith.constant 5.000000e-01 : f32
    %83 = vector.broadcast %cst_41 : f32 to vector<8x128xf32>
    %84 = arith.mulf %83, %82 : vector<8x128xf32>
    %cst_42 = arith.constant 5.000000e-01 : f32
    %85 = vector.broadcast %cst_42 : f32 to vector<8x128xf32>
    %86 = arith.addf %84, %85 : vector<8x128xf32>
    %87 = vector.extract_strided_slice %81 {offsets = [0, 128], sizes = [8, 128], strides = [1, 1]} : vector<8x512xf32> to vector<8x128xf32>
    %cst_43 = arith.constant 5.000000e-01 : f32
    %88 = vector.broadcast %cst_43 : f32 to vector<8x128xf32>
    %89 = arith.mulf %88, %87 : vector<8x128xf32>
    %cst_44 = arith.constant 5.000000e-01 : f32
    %90 = vector.broadcast %cst_44 : f32 to vector<8x128xf32>
    %91 = arith.addf %89, %90 : vector<8x128xf32>
    %92 = vector.extract_strided_slice %81 {offsets = [0, 256], sizes = [8, 128], strides = [1, 1]} : vector<8x512xf32> to vector<8x128xf32>
    %93 = vector.extract_strided_slice %81 {offsets = [0, 384], sizes = [8, 128], strides = [1, 1]} : vector<8x512xf32> to vector<8x128xf32>
    %cst_45 = arith.constant 5.000000e-01 : f32
    %94 = vector.broadcast %cst_45 : f32 to vector<8x128xf32>
    %95 = arith.mulf %94, %93 : vector<8x128xf32>
    %cst_46 = arith.constant 5.000000e-01 : f32
    %96 = vector.broadcast %cst_46 : f32 to vector<8x128xf32>
    %97 = arith.addf %95, %96 : vector<8x128xf32>
    %98 = arith.mulf %91, %69 : vector<8x128xf32>
    %99 = arith.mulf %86, %92 : vector<8x128xf32>
    %100 = arith.addf %98, %99 : vector<8x128xf32>
    %101 = math.tanh %100 : vector<8x128xf32>
    %102 = arith.mulf %97, %101 : vector<8x128xf32>
    %103 = arith.index_cast %75 : i32 to index
    %c0_47 = arith.constant 0 : index
    %104 = vector.load %arg7[%103, %c0_47] : memref<32x128xf32, #tpu.memory_space<vmem>>, vector<8x128xf32>
    tpu.vector_store %arg7[%103, %c0_47], %102 {strides = array<i32>} : memref<32x128xf32, #tpu.memory_space<vmem>>, vector<8x128xf32>,
    %c3_i32 = arith.constant 3 : i32
    %c8_i32_48 = arith.constant 8 : i32
    %105 = arith.muli %c3_i32, %c8_i32_48 : i32
    %106 = tpu.assume_multiple %105, 8 : i32
    %107 = arith.index_cast %106 : i32 to index
    %c0_49 = arith.constant 0 : index
    %108 = vector.load %arg10[%107, %c0_49] : memref<32x512xf32, #tpu.memory_space<vmem>>, vector<8x512xf32>
    %c0_50 = arith.constant 0 : index
    %c0_51 = arith.constant 0 : index
    %109 = vector.load %arg3[%c0_50, %c0_51] : memref<128x512xf32, #tpu.memory_space<vmem>>, vector<128x512xf32>
    %cst_52 = arith.constant dense<0.000000e+00> : vector<8x512xf32>
    %110 = tpu.matmul %102, %109, %cst_52 {dimension_numbers = #tpu.dot_dimension_numbers<[1], [0], [0], [1], [0, 0, 1, 1], [], []>} : vector<8x128xf32>, vector<128x512xf32>, vector<8x512xf32> -> vector<8x512xf32>
    %111 = arith.addf %108, %110 : vector<8x512xf32>
    %112 = math.tanh %111 : vector<8x512xf32>
    %113 = vector.extract_strided_slice %112 {offsets = [0, 0], sizes = [8, 128], strides = [1, 1]} : vector<8x512xf32> to vector<8x128xf32>
    %cst_53 = arith.constant 5.000000e-01 : f32
    %114 = vector.broadcast %cst_53 : f32 to vector<8x128xf32>
    %115 = arith.mulf %114, %113 : vector<8x128xf32>
    %cst_54 = arith.constant 5.000000e-01 : f32
    %116 = vector.broadcast %cst_54 : f32 to vector<8x128xf32>
    %117 = arith.addf %115, %116 : vector<8x128xf32>
    %118 = vector.extract_strided_slice %112 {offsets = [0, 128], sizes = [8, 128], strides = [1, 1]} : vector<8x512xf32> to vector<8x128xf32>
    %cst_55 = arith.constant 5.000000e-01 : f32
    %119 = vector.broadcast %cst_55 : f32 to vector<8x128xf32>
    %120 = arith.mulf %119, %118 : vector<8x128xf32>
    %cst_56 = arith.constant 5.000000e-01 : f32
    %121 = vector.broadcast %cst_56 : f32 to vector<8x128xf32>
    %122 = arith.addf %120, %121 : vector<8x128xf32>
    %123 = vector.extract_strided_slice %112 {offsets = [0, 256], sizes = [8, 128], strides = [1, 1]} : vector<8x512xf32> to vector<8x128xf32>
    %124 = vector.extract_strided_slice %112 {offsets = [0, 384], sizes = [8, 128], strides = [1, 1]} : vector<8x512xf32> to vector<8x128xf32>
    %cst_57 = arith.constant 5.000000e-01 : f32
    %125 = vector.broadcast %cst_57 : f32 to vector<8x128xf32>
    %126 = arith.mulf %125, %124 : vector<8x128xf32>
    %cst_58 = arith.constant 5.000000e-01 : f32
    %127 = vector.broadcast %cst_58 : f32 to vector<8x128xf32>
    %128 = arith.addf %126, %127 : vector<8x128xf32>
    %129 = arith.mulf %122, %100 : vector<8x128xf32>
    %130 = arith.mulf %117, %123 : vector<8x128xf32>
    %131 = arith.addf %129, %130 : vector<8x128xf32>
    %132 = math.tanh %131 : vector<8x128xf32>
    %133 = arith.mulf %128, %132 : vector<8x128xf32>
    %134 = arith.index_cast %106 : i32 to index
    %c0_59 = arith.constant 0 : index
    %135 = vector.load %arg7[%134, %c0_59] : memref<32x128xf32, #tpu.memory_space<vmem>>, vector<8x128xf32>
    tpu.vector_store %arg7[%134, %c0_59], %133 {strides = array<i32>} : memref<32x128xf32, #tpu.memory_space<vmem>>, vector<8x128xf32>,
    %c4_i32 = arith.constant 4 : i32
    %c0_60 = arith.constant 0 : index
    %c0_61 = arith.constant 0 : index
    %136 = vector.load %arg11[%c0_60, %c0_61] : memref<8x128xf32, #tpu.memory_space<vmem>>, vector<8x128xf32>
    tpu.vector_store %arg11[%c0_60, %c0_61], %133 {strides = array<i32>} : memref<8x128xf32, #tpu.memory_space<vmem>>, vector<8x128xf32>,
    %c0_62 = arith.constant 0 : index
    %c0_63 = arith.constant 0 : index
    %137 = vector.load %arg12[%c0_62, %c0_63] : memref<8x128xf32, #tpu.memory_space<vmem>>, vector<8x128xf32>
    tpu.vector_store %arg12[%c0_62, %c0_63], %131 {strides = array<i32>} : memref<8x128xf32, #tpu.memory_space<vmem>>, vector<8x128xf32>,
    %c0_64 = arith.constant 0 : index
    %c0_65 = arith.constant 0 : index
    %138 = vector.load %arg8[%c0_64, %c0_65] : memref<8x128xf32, #tpu.memory_space<vmem>>, vector<8x128xf32>
    tpu.vector_store %arg8[%c0_64, %c0_65], %133 {strides = array<i32>} : memref<8x128xf32, #tpu.memory_space<vmem>>, vector<8x128xf32>,
    %c0_66 = arith.constant 0 : index
    %c0_67 = arith.constant 0 : index
    %139 = vector.load %arg9[%c0_66, %c0_67] : memref<8x128xf32, #tpu.memory_space<vmem>>, vector<8x128xf32>
    tpu.vector_store %arg9[%c0_66, %c0_67], %131 {strides = array<i32>} : memref<8x128xf32, #tpu.memory_space<vmem>>, vector<8x128xf32>,
    return
  }
  func.func @transform_0(%arg0: i32) -> (i32, i32) {
    %c0_i32 = arith.constant 0 : i32
    %c0_i32_0 = arith.constant 0 : i32
    return %arg0, %c0_i32 : i32, i32
  }
  func.func @transform_1(%arg0: i32) -> (i32, i32) {
    %c0_i32 = arith.constant 0 : i32
    %c0_i32_0 = arith.constant 0 : i32
    %c0_i32_1 = arith.constant 0 : i32
    return %c0_i32, %c0_i32_0 : i32, i32
  }
  func.func @transform_2(%arg0: i32) -> (i32, i32) {
    %c0_i32 = arith.constant 0 : i32
    %c0_i32_0 = arith.constant 0 : i32
    %c0_i32_1 = arith.constant 0 : i32
    return %c0_i32, %c0_i32_0 : i32, i32
  }
  func.func @transform_3(%arg0: i32) -> (i32, i32) {
    %c0_i32 = arith.constant 0 : i32
    %c0_i32_0 = arith.constant 0 : i32
    %c0_i32_1 = arith.constant 0 : i32
    return %c0_i32, %c0_i32_0 : i32, i32
  }
  func.func @transform_4(%arg0: i32) -> (i32, i32) {
    %c0_i32 = arith.constant 0 : i32
    %c0_i32_0 = arith.constant 0 : i32
    %c0_i32_1 = arith.constant 0 : i32
    return %c0_i32, %c0_i32_0 : i32, i32
  }
  func.func @transform_5(%arg0: i32) -> (i32, i32) {
    %c0_i32 = arith.constant 0 : i32
    %c0_i32_0 = arith.constant 0 : i32
    %c0_i32_1 = arith.constant 0 : i32
    return %c0_i32, %c0_i32_0 : i32, i32
  }
  func.func @transform_6(%arg0: i32) -> (i32, i32) {
    %c0_i32 = arith.constant 0 : i32
    %c0_i32_0 = arith.constant 0 : i32
    return %arg0, %c0_i32 : i32, i32
  }
  func.func @transform_7(%arg0: i32) -> (i32, i32) {
    %c0_i32 = arith.constant 0 : i32
    %c0_i32_0 = arith.constant 0 : i32
    %c0_i32_1 = arith.constant 0 : i32
    return %c0_i32, %c0_i32_0 : i32, i32
  }
  func.func @transform_8(%arg0: i32) -> (i32, i32) {
    %c0_i32 = arith.constant 0 : i32
    %c0_i32_0 = arith.constant 0 : i32
    %c0_i32_1 = arith.constant 0 : i32
    return %c0_i32, %c0_i32_0 : i32, i32
  }
}

</mosaic_0001>

<bundles_post_ra>
// kernel: tpu_custom_call.1
= control target key start
LH: loop header
LB: loop body
LE: loop exit
PB: predicated region body
PF: predicated region fallthrough
CT: control target
= control target key end

     0   :  { %14 = vsyncpa [#allocation6], 0  ;;  %s2767_s0 = inlined_call_operand.vmem [shape: f32[64,16], index: 0, kind: input, shape index: {}]   ;;  %s2768_s1 = inlined_call_operand.vmem [shape: f32[16,512], index: 1, kind: input, shape index: {}]   ;;  %s2769_s2 = inlined_call_operand.hbm [shape: f32[128,512], index: 2, kind: input, shape index: {}]   ;;  %s2770_s3 = inlined_call_operand.vmem [shape: f32[1,512], index: 3, kind: input, shape index: {}]   ;;  %s2771_s4 = inlined_call_operand.vmem [shape: f32[8,128], index: 4, kind: input, shape index: {}]   ;;  %s2772_s5 = inlined_call_operand.vmem [shape: f32[8,128], index: 5, kind: input, shape index: {}]   ;;  %s2773_s6 = inlined_call_operand.hbm [shape: f32[64,128], index: 6, kind: output, shape index: {0}]   ;;  %s2774_s7 = inlined_call_operand.hbm [shape: f32[8,128], index: 7, kind: output, shape index: {1}]   ;;  %s2775_s8 = inlined_call_operand.hbm [shape: f32[8,128], index: 8, kind: output, shape index: {2}]  }
   0x1   :  { %15 = vsyncpa [#allocation7], 0 }
   0x2   :  { %17 = vsyncpa [#allocation7 + $0x1], 0 }
   0x3   :  { %18 = vsyncpa [#allocation10], 0  ;;  %s2284_s27 = smov 0   ;;  %s2286_s28 = smov 0  }
   0x4   :  { %s2288_s29 = smov 0   ;;  %s2290_s30 = smov 0  }
   0x5 LB: > { %s2305_s9 = sadd.s32 4294967295, %s2228_s30   ;;  %s1642_s10 = sadd.s32 4294967294, %s2228_s30   ;;  %s2228_s30 = sphi %s2290_s30, %s2803_s30   ;;  %s2224_s29 = sphi %s2288_s29, %s2802_s29   ;;  %s2220_s28 = sphi %s2286_s28, %s2801_s28   ;;  %s2216_s27 = sphi %s2284_s27, %s2800_s27  }
   0x6   : > { %s2309_s11 = sadd.s32 1, %s2228_s30   ;;  %s162_s12 = sadd.s32 1, %s2224_s29 }
   0x7   : > { %s159_s13 = ssub.s32 %s2228_s30, %s2309_s11  ;;  %p172_p0 = scmp.ne.s32.totalorder %s2224_s29, %s2220_s28 }
   0x8   : > { %p160_p1 = scmp.eq.s32.totalorder %s159_s13, 0  ;;  %p2776_p2 = scmp.eq.s32.totalorder %s2305_s9, 1 }
   0x9   : > { %p178_p3 = scmp.ne.s32.totalorder %s2220_s28, %s2216_s27  ;;  %p179_p4 = scmp.eq.s32.totalorder %s1642_s10, 1 }
   0xa   : > { %s2320_s14 = scalar_select %p160_p1, %s2224_s29, %s162_s12  }
   0xb   : > { %p2324_p5 = por %p2776_p2, %p172_p0  ;;  %p2328_p6 = por %p179_p4, %p178_p3 }
   0xc   : > { %p1643_p7 = scmp.ge.s32.totalorder %s2228_s30, 1  ;;  %p228_p8 = scmp.lt.s32.totalorder %s2228_s30, 3 }
   0xd   : > { %s2781_s15 = scalar_select %p2324_p5, 1, 0 }
   0xe   : > { %s2782_s16 = scalar_select %p2328_p6, 1, 0 }
   0xf   : > { %p2777_p10 = scmp.eq.s32.totalorder %s2305_s9, 0  ;;  %p2336_p11 = pnand %p1643_p7, %p228_p8 }
  0x10   : > { %s2230_s18 = smov [#allocation5]   ;;  %s2078_s23 = scalar_lea.hbm %s2769_s2, 8192 }
  0x11   : > { %s2783_s17 = scalar_select %p2336_p11, 1, 0 }
  0x12   : > { %s243_s19 = sshll.u32 %s2230_s18, 4  ;;  %p1983_p12 = pneg %p2336_p11  ;;  %s244_s19 = int_to_ptr.vmem [resolvable:$true] %s243_s19 }
  0x13   : > { %p2079_p0 = scmp.ne.s32.totalorder %s2769_s2, %s2078_s23  ;;  %p2085_p7 = scmp.lt.u32.totalorder %s2078_s23, %s2769_s2 }
  0x14   : > { %p2344_p13 = pnand %p2777_p10, %p1983_p12 }
  0x16   : > { %p2080_p1 = pneg %p2344_p13 }
  0x18   : > { %p2081_p3 = pnand %p2080_p1, %p2079_p0 }
  0x1a   : > { %p2082_p4 = pneg %p2081_p3 }
  0x1c   : > { %p2087_p8 = pnand %p2085_p7, %p2082_p4 }
  0x1e   : > { %2090 = shalt.err (!%p2087_p8)
}
  0x1f   : > { %s2091_s12 = scalar_lea.vmem %s244_s19, 8192  ;;  %p2099_p10 = scmp.lt.s32.totalorder %s244_s19, %s244_s19 }
  0x20   : > { %p2092_p12 = scmp.ne.s32.totalorder %s244_s19, %s2091_s12  ;;  %p2100_p6 = scmp.lt.s32.totalorder %s2091_s12, %s2091_s12 }
  0x22   : > { %p2094_p2 = pnand %p2092_p12, %p2080_p1  ;;  %p2101_p5 = por %p2100_p6, %p2099_p10 }
  0x24   : > { %p2095_p9 = pneg %p2094_p2 }
  0x26   : > { %p2102_p11 = pnand %p2101_p5, %p2095_p9 }
  0x28   : > { %2105 = shalt.err (!%p2102_p11)
}
  0x29   : > { %s2231_s13 = smov 512   ;;  %s2232_s18 = smov 32  }
  0x2a   : > { %1986 = dma.hbm_to_vmem [thread:$0]  (!%p2344_p13), %s2769_s2, 8192, %s244_s19, [#allocation6], %s2231_s13, %s2231_s13, %s2232_s18  }
  0x2b   : > { %p2785_p0 = scmp.ne.s32.totalorder %s2783_s17, 0 }
  0x2c   : > { %p2786_p3 = scmp.eq.s32.totalorder (!%p2785_p0), %s2305_s9, 0 }
  0x2d   : > { %277 = sbr.rel (%p2785_p0) target bundleno = 1159 (0x487), region = 44 }
  0x34   : > { %2203 = dma.done.wait (%p2786_p3), [#allocation6], 8192   ;;  %p2787_p2 = pmov %p2786_p3 }
  0x35   : > { %s2780_s23 = sand.u32 1, %s2220_s28   ;;  %s1649_s24 = sshll.u32 %s2305_s9, 2 }
  0x36   : > { %2205 = vsyncadd (%p2787_p2), [#allocation6], 4294959104  ;;  %s1648_s20 = sshll.u32 %s2780_s23, 5  ;;  %p312_p5 = scmp.lt.s32.totalorder %s1649_s24, 7 }
  0x37   : > { %s2379_s10 = scalar_lea.vmem [#allocation8], %s1648_s20  ;;  %p2788_p6 = scmp.ne.s32.totalorder %s2305_s9, 0 }
  0x38   : > { %s2805_s24 = smov (!%p312_p5, %s1649_s24), 7  ;;  %v322_v0 = vld [vmem:[%s2771_s4] sm:$0xff] (!%p2788_p6) }
  0x39   : > { %s1650_s25 = sshll.u32 %s2805_s24, 3  ;;  %321 = sbr.rel (%p2788_p6) target bundleno = 64 (0x40), region = 52  ;;  %v324_v1 = vld [vmem:[%s2772_s5] sm:$0xff] (!%p2788_p6)  ;;  %323 = vst [vmem:[#allocation3] sm:$0xff] (!%p2788_p6), %v322_v0 }
  0x3a   : > { %s2377_s17 = scalar_lea.vmem %s2767_s0, %s1650_s25  ;;  %325 = vst [vmem:[#allocation4] sm:$0xff] (!%p2788_p6), %v324_v1 }
  0x40 PF: > { %v331_v2 = vld [vmem:[%s2768_s1 + $0x8] sm:$0xff]  ;;  %v333_v4 = vld [vmem:[%s2768_s1 + $0x18] sm:$0xff]  ;;  %v330_v7 = vld [vmem:[%s2768_s1] sm:$0xff]  ;;  %v2233_v9 = vmov 0.0   ;;  %vm360_vm0 = vcmask 130048   ;;  %s2234_s26 = smov [#allocation9]  }
  0x41   : > { %v335_v3 = vld [vmem:[%s2768_s1 + $0x28] sm:$0xff]  ;;  %v337_v6 = vld [vmem:[%s2768_s1 + $0x38] sm:$0xff]  ;;  %v334_v8 = vld [vmem:[%s2768_s1 + $0x20] sm:$0xff]  ;;  %437 = vmatprep.mubr.f32.mxu0 %v2233_v9  ;;  %526 = vmatprep.mubr.f32.mxu1 %v2233_v9  ;;  %s1536_s12 = sshll.u32 %s2234_s26, 4  ;;  %s1672_s13 = sshll.u32 %s2305_s9, 9  ;;  %s1537_s12 = int_to_ptr.vmem [resolvable:$true] %s1536_s12 }
  0x42   : > { %v1673_v5 = vpack.c.bf16 %v335_v3, %v331_v2  ;;  %v1677_v10 = vpack.c.bf16 %v337_v6, %v333_v4  ;;  %v1675_v11 = vpack.c.bf16 %v334_v8, %v330_v7  ;;  %v332_v12 = vld [vmem:[%s2768_s1 + $0x10] sm:$0xff]  ;;  %v577_v14 = vld [vmem:[#allocation5 + $0x8] sm:$0xff]  ;;  %v579_v17 = vld [vmem:[#allocation5 + $0x18] sm:$0xff]  ;;  %s1522_s18 = sshll.u32 %s2379_s10, 4  ;;  %s2235_s21 = smov [#allocation11]   ;;  %s2674_s18 = int_to_ptr.vmem [resolvable:$true] %s1522_s18 }
  0x43   : > { %v336_v13 = vld [vmem:[%s2768_s1 + $0x30] sm:$0xff]  ;;  %v581_v16 = vld [vmem:[#allocation5 + $0x28] sm:$0xff]  ;;  %v583_v18 = vld [vmem:[#allocation5 + $0x38] sm:$0xff]  ;;  %s1547_s22 = sshll.u32 %s2235_s21, 4  ;;  %s2672_s25 = scalar_lea.hbm %s2773_s6, %s1672_s13  ;;  %s2677_s22 = int_to_ptr.vmem [resolvable:$true] %s1547_s22 }
  0x44   : > { %1674 = vmatprep.subr.bf16.mxu0 %v1673_v5  ;;  %v1679_v15 = vpack.c.bf16 %v336_v13, %v332_v12  ;;  %1678 = vmatprep.subr.bf16.mxu1 %v1677_v10  ;;  %v2415_v19 = vpack.c.bf16 %v581_v16, %v577_v14  ;;  %v2417_v20 = vpack.c.bf16 %v583_v18, %v579_v17  ;;  %v326_v21 = vld [vmem:[%s2377_s17] sm:$0xff]  ;;  %v576_v22 = vld [vmem:[#allocation5] sm:$0xff]  ;;  %v585_v27 = vld [vmem:[#allocation5 + $0x48] sm:$0xff]  ;;  %s2106_s19 = scalar_lea.vmem %s1537_s12, 128  ;;  %p2789_p10 = scmp.eq.s32.totalorder %s2305_s9, 1 }
  0x45   : > { %1676 = vmatpush1.bf16.msra.mxu0 %v1675_v11  ;;  %v580_v23 = vld [vmem:[#allocation5 + $0x20] sm:$0xff]  ;;  %v578_v25 = vld [vmem:[#allocation5 + $0x10] sm:$0xff]  ;;  %v589_v29 = vld [vmem:[#allocation5 + $0x68] sm:$0xff]  ;;  %p2107_p9 = scmp.ne.s32.totalorder %s1537_s12, %s2106_s19  ;;  %p2113_p1 = scmp.lt.s32.totalorder %s1537_s12, %s1537_s12 }
  0x46   : > { %1680 = vmatpush1.bf16.msra.mxu1 %v1679_v15  ;;  %v2420_v24 = vpack.c.bf16 %v580_v23, %v576_v22  ;;  %v582_v26 = vld [vmem:[#allocation5 + $0x30] sm:$0xff]  ;;  %1682 = vmatprep.subr.bf16.mxu0 %v2415_v19  ;;  %v587_v30 = vld [vmem:[#allocation5 + $0x58] sm:$0xff]  ;;  %v2427_v32 = vpack.c.bf16 %v589_v29, %v585_v27  ;;  %v584_v34 = vld [vmem:[#allocation5 + $0x40] sm:$0xff]  ;;  %p2114_p4 = scmp.lt.s32.totalorder %s2106_s19, %s2106_s19 }
  0x47   : > { %1714 = vmatprep.subr.bf16.mxu1 %v2417_v20  ;;  %v2424_v28 = vpack.c.bf16 %v582_v26, %v578_v25  ;;  %v591_v31 = vld [vmem:[#allocation5 + $0x78] sm:$0xff]  ;;  %v588_v35 = vld [vmem:[#allocation5 + $0x60] sm:$0xff]  ;;  %v586_v36 = vld [vmem:[#allocation5 + $0x50] sm:$0xff]  ;;  %p2108_p11 = pnand %p2107_p9, %p2789_p10 }
  0x48   : > { %1652 = vmatmul.mubr.msk.f32.vlgmr.msra.gmra.mrb[0].mxu0 %vm360_vm0, %v326_v21  ;;  %v2429_v33 = vpack.c.bf16 %v591_v31, %v587_v30  ;;  %v2433_v37 = vpack.c.bf16 %v588_v35, %v584_v34  ;;  %v590_v38 = vld [vmem:[#allocation5 + $0x70] sm:$0xff]  ;;  %v593_v39 = vld [vmem:[#allocation5 + $0x88] sm:$0xff]  ;;  %v595_v43 = vld [vmem:[#allocation5 + $0x98] sm:$0xff]  ;;  %p2115_p7 = por %p2114_p4, %p2113_p1 }
  0x49   : > { %1656 = vmatmul.mubr.msk.f32.vlgmr.msra.gmra.mrb[0].mxu1 %vm360_vm0, %v326_v21  ;;  %1684 = vmatpush1.bf16.msra.mxu0 %v2420_v24  ;;  %v597_v40 = vld [vmem:[#allocation5 + $0xa8] sm:$0xff]  ;;  %v2437_v41 = vpack.c.bf16 %v590_v38, %v586_v36  ;;  %v599_v44 = vld [vmem:[#allocation5 + $0xb8] sm:$0xff]  ;;  %v592_v45 = vld [vmem:[#allocation5 + $0x80] sm:$0xff]  ;;  %p2109_p13 = pneg %p2108_p11 }
  0x4a   : > { %1716 = vmatpush1.bf16.msra.mxu1 %v2424_v28  ;;  %1686 = vmatprep.subr.bf16.mxu0 %v2427_v32  ;;  %v2439_v42 = vpack.c.bf16 %v597_v40, %v593_v39  ;;  %v2442_v46 = vpack.c.bf16 %v599_v44, %v595_v43  ;;  %v596_v47 = vld [vmem:[#allocation5 + $0xa0] sm:$0xff]  ;;  %v594_v48 = vld [vmem:[#allocation5 + $0x90] sm:$0xff]  ;;  %v601_v50 = vld [vmem:[#allocation5 + $0xc8] sm:$0xff] }
  0x4b   : > { %1718 = vmatprep.subr.bf16.mxu1 %v2429_v33  ;;  %v598_v49 = vld [vmem:[#allocation5 + $0xb0] sm:$0xff]  ;;  %443 = vmatprep.mubr.f32.mxu0 %v2233_v9  ;;  %v605_v51 = vld [vmem:[#allocation5 + $0xe8] sm:$0xff]  ;;  %v603_v52 = vld [vmem:[#allocation5 + $0xd8] sm:$0xff]  ;;  %v2447_v53 = vpack.c.bf16 %v596_v47, %v592_v45  ;;  %p2116_p8 = pnand %p2115_p7, %p2109_p13 }
  0x4c   : > { %532 = vmatprep.mubr.f32.mxu1 %v2233_v9  ;;  %v607_v54 = vld [vmem:[#allocation5 + $0xf8] sm:$0xff]  ;;  %v2451_v55 = vpack.c.bf16 %v598_v49, %v594_v48  ;;  %v2453_v56 = vpack.c.bf16 %v605_v51, %v601_v50  ;;  %v600_v57 = vld [vmem:[#allocation5 + $0xc0] sm:$0xff]  ;;  %v602_v59 = vld [vmem:[#allocation5 + $0xd0] sm:$0xff] }
  0x4d   : > { %1688 = vmatpush1.bf16.msra.mxu0 %v2433_v37  ;;  %v604_v58 = vld [vmem:[#allocation5 + $0xe0] sm:$0xff]  ;;  %v2456_v60 = vpack.c.bf16 %v607_v54, %v603_v52  ;;  %v606_v61 = vld [vmem:[#allocation5 + $0xf0] sm:$0xff]  ;;  %v609_v62 = vld [vmem:[#allocation5 + $0x108] sm:$0xff] }
  0x4e   : > { %1720 = vmatpush1.bf16.msra.mxu1 %v2437_v41  ;;  %1690 = vmatprep.subr.bf16.mxu0 %v2439_v42  ;;  %v613_v63 = vld [vmem:[#allocation5 + $0x128] sm:$0xff]  ;;  %v611_v0 = vld [vmem:[#allocation5 + $0x118] sm:$0xff]  ;;  %v2459_v2 = vpack.c.bf16 %v604_v58, %v600_v57  ;;  %v2464_v4 = vpack.c.bf16 %v606_v61, %v602_v59  ;;  %v608_v6 = vld [vmem:[#allocation5 + $0x100] sm:$0xff] }
  0x4f   : > { %1722 = vmatprep.subr.bf16.mxu1 %v2442_v46  ;;  %v615_v1 = vld [vmem:[#allocation5 + $0x138] sm:$0xff]  ;;  %v2466_v5 = vpack.c.bf16 %v613_v63, %v609_v62  ;;  %v612_v7 = vld [vmem:[#allocation5 + $0x120] sm:$0xff]  ;;  %v610_v8 = vld [vmem:[#allocation5 + $0x110] sm:$0xff] }
  0x50   : > { %v327_v3 = vld [vmem:[%s2377_s17 + $0x8] sm:$0xff]  ;;  %v2469_v10 = vpack.c.bf16 %v615_v1, %v611_v0  ;;  %v614_v11 = vld [vmem:[#allocation5 + $0x130] sm:$0xff]  ;;  %v617_v12 = vld [vmem:[#allocation5 + $0x148] sm:$0xff]  ;;  %v2476_v17 = vpack.c.bf16 %v612_v7, %v608_v6  ;;  %v340_v6 = vlaneseq }
  0x51   : > { %1692 = vmatpush1.bf16.msra.mxu0 %v2447_v53  ;;  %v621_v13 = vld [vmem:[#allocation5 + $0x168] sm:$0xff]  ;;  %1657 = vmatmul.mubr.msk.f32.gmra.mrb[2].mxu1 %vm360_vm0, %v327_v3  ;;  %v619_v14 = vld [vmem:[#allocation5 + $0x158] sm:$0xff]  ;;  %v328_v16 = vld [vmem:[%s2377_s17 + $0x10] sm:$0xff]  ;;  %v2481_v18 = vpack.c.bf16 %v614_v11, %v610_v8 }
  0x52   : > { %1724 = vmatpush1.bf16.msra.mxu1 %v2451_v55  ;;  %1694 = vmatprep.subr.bf16.mxu0 %v2453_v56  ;;  %v623_v15 = vld [vmem:[#allocation5 + $0x178] sm:$0xff]  ;;  %v2483_v21 = vpack.c.bf16 %v621_v13, %v617_v12  ;;  %v616_v22 = vld [vmem:[#allocation5 + $0x140] sm:$0xff]  ;;  %v618_v25 = vld [vmem:[#allocation5 + $0x150] sm:$0xff]  ;;  %v341_v7 = vshrl.u32 %v340_v6, 7 }
  0x53   : > { %1726 = vmatprep.subr.bf16.mxu1 %v2456_v60  ;;  %1653 = vmatmul.mubr.msk.f32.gmra.mrb[2].mxu0 %vm360_vm0, %v327_v3  ;;  %v620_v23 = vld [vmem:[#allocation5 + $0x160] sm:$0xff]  ;;  %v2486_v26 = vpack.c.bf16 %v623_v15, %v619_v14  ;;  %v622_v27 = vld [vmem:[#allocation5 + $0x170] sm:$0xff]  ;;  %v625_v29 = vld [vmem:[#allocation5 + $0x188] sm:$0xff] }
  0x54   : > { %449 = vmatprep.mubr.f32.mxu0 %v2233_v9  ;;  %538 = vmatprep.mubr.f32.mxu1 %v2233_v9  ;;  %v629_v30 = vld [vmem:[#allocation5 + $0x1a8] sm:$0xff]  ;;  %v627_v31 = vld [vmem:[#allocation5 + $0x198] sm:$0xff]  ;;  %v2493_v36 = vpack.c.bf16 %v620_v23, %v616_v22  ;;  %v2498_v38 = vpack.c.bf16 %v622_v27, %v618_v25  ;;  %v624_v40 = vld [vmem:[#allocation5 + $0x180] sm:$0xff]  ;;  %v342_v8 = vsub.s32 0, %v341_v7  ;;  %v346_v12 = vsub.s32 1, %v341_v7 }
  0x55   : > { %1696 = vmatpush1.bf16.msra.mxu0 %v2459_v2  ;;  %1658 = vmatmul.mubr.msk.f32.gmra.mrb[4].mxu1 %vm360_vm0, %v328_v16  ;;  %v631_v34 = vld [vmem:[#allocation5 + $0x1b8] sm:$0xff]  ;;  %v329_v35 = vld [vmem:[%s2377_s17 + $0x18] sm:$0xff]  ;;  %v2500_v39 = vpack.c.bf16 %v629_v30, %v625_v29  ;;  %v628_v43 = vld [vmem:[#allocation5 + $0x1a0] sm:$0xff]  ;;  %v350_v13 = vsub.s32 2, %v341_v7 }
  0x56   : > { %1728 = vmatpush1.bf16.msra.mxu1 %v2464_v4  ;;  %1698 = vmatprep.subr.bf16.mxu0 %v2466_v5  ;;  %v626_v44 = vld [vmem:[#allocation5 + $0x190] sm:$0xff]  ;;  %v2503_v45 = vpack.c.bf16 %v631_v34, %v627_v31  ;;  %v633_v48 = vld [vmem:[#allocation5 + $0x1c8] sm:$0xff]  ;;  %v635_v50 = vld [vmem:[#allocation5 + $0x1d8] sm:$0xff]  ;;  %v2509_v52 = vpack.c.bf16 %v628_v43, %v624_v40  ;;  %v354_v34 = vsub.s32 3, %v341_v7 }
  0x57   : > { %1730 = vmatprep.subr.bf16.mxu1 %v2469_v10  ;;  %1654 = vmatmul.mubr.msk.f32.gmra.mrb[4].mxu0 %vm360_vm0, %v328_v16  ;;  %v630_v47 = vld [vmem:[#allocation5 + $0x1b0] sm:$0xff]  ;;  %v637_v49 = vld [vmem:[#allocation5 + $0x1e8] sm:$0xff]  ;;  %v639_v51 = vld [vmem:[#allocation5 + $0x1f8] sm:$0xff] }
  0x58   : > { %455 = vmatprep.mubr.f32.mxu0 %v2233_v9  ;;  %544 = vmatprep.mubr.f32.mxu1 %v2233_v9  ;;  %v2514_v54 = vpack.c.bf16 %v630_v47, %v626_v44  ;;  %v2516_v57 = vpack.c.bf16 %v637_v49, %v633_v48  ;;  %v632_v58 = vld [vmem:[#allocation5 + $0x1c0] sm:$0xff]  ;;  %v2519_v61 = vpack.c.bf16 %v639_v51, %v635_v50  ;;  %v634_v62 = vld [vmem:[#allocation5 + $0x1d0] sm:$0xff]  ;;  %v568_v51 = vld [vmem:[#allocation4] sm:$0xff] }
  0x59   : > { %1700 = vmatpush1.bf16.msra.mxu0 %v2476_v17  ;;  %1659 = vmatmul.mubr.msk.f32.gmra.mrb[6].mxu1 %vm360_vm0, %v329_v35  ;;  %v636_v59 = vld [vmem:[#allocation5 + $0x1e0] sm:$0xff]  ;;  %v638_v63 = vld [vmem:[#allocation5 + $0x1f0] sm:$0xff] }
  0x5a   : > { %1732 = vmatpush1.bf16.msra.mxu1 %v2481_v18  ;;  %1702 = vmatprep.subr.bf16.mxu0 %v2483_v21  ;;  %v2522_v0 = vpack.c.bf16 %v636_v59, %v632_v58  ;;  %v2526_v1 = vpack.c.bf16 %v638_v63, %v634_v62  ;;  %v567_v3 = vld [vmem:[#allocation3] sm:$0xff] }
  0x5b   : > { %1734 = vmatprep.subr.bf16.mxu1 %v2486_v26  ;;  %1655 = vmatmul.mubr.msk.f32.gmra.mrb[6].mxu0 %vm360_vm0, %v329_v35  ;;  %v338_v11 = vld [vmem:[%s2770_s3] sm:$0xf] }
  0x5c   : > { %704 = vmatprep.mubr.f32.mxu0 %v2233_v9  ;;  %775 = vmatprep.mubr.f32.mxu1 %v2233_v9  ;;  %v2570_v14 = vrot.slane %v338_v11, %v342_v8  ;;  %v2572_v15 = vrot.slane %v338_v11, %v346_v12  ;;  %v2574_v16 = vrot.slane %v338_v11, %v350_v13 }
  0x5d   : > { %1704 = vmatpush1.bf16.msra.mxu0 %v2493_v36  ;;  %v2579_v35 = vrot.slane %v338_v11, %v354_v34 }
  0x5e   : > { %1736 = vmatpush1.bf16.msra.mxu1 %v2498_v38  ;;  %1706 = vmatprep.subr.bf16.mxu0 %v2500_v39 }
  0x5f   : > { %1738 = vmatprep.subr.bf16.mxu1 %v2503_v45 }
  0x61   : > { %1708 = vmatpush1.bf16.msra.mxu0 %v2509_v52 }
  0x62   : > { %1740 = vmatpush1.bf16.msra.mxu1 %v2514_v54  ;;  %1710 = vmatprep.subr.bf16.mxu0 %v2516_v57 }
  0x63   : > { %1742 = vmatprep.subr.bf16.mxu1 %v2519_v61 }
  0x65   : > { %1712 = vmatpush1.bf16.msra.mxu0 %v2522_v0 }
  0x66   : > { %1744 = vmatpush1.bf16.msra.mxu1 %v2526_v1  ;;  %1746 = vmatprep.subr.bf16.mxu0 %v2415_v19 }
  0x67   : > { %1778 = vmatprep.subr.bf16.mxu1 %v2417_v20 }
  0x68   : > { %705 = vmatmul.mubr.f32.vlgmr.msra.gmra.mrb[0].mxu0 %v567_v3 }
  0x69   : > { %776 = vmatmul.mubr.f32.vlgmr.msra.gmra.mrb[0].mxu1 %v567_v3  ;;  %1748 = vmatpush1.bf16.msra.mxu0 %v2420_v24 }
  0x6a   : > { %1780 = vmatpush1.bf16.msra.mxu1 %v2424_v28  ;;  %1750 = vmatprep.subr.bf16.mxu0 %v2427_v32 }
  0x6b   : > { %1782 = vmatprep.subr.bf16.mxu1 %v2429_v33  ;;  %937 = vmatprep.mubr.f32.mxu0 %v2233_v9 }
  0x6c   : > { %1008 = vmatprep.mubr.f32.mxu1 %v2233_v9 }
  0x6d   : > { %1752 = vmatpush1.bf16.msra.mxu0 %v2433_v37 }
  0x6e   : > { %1784 = vmatpush1.bf16.msra.mxu1 %v2437_v41  ;;  %1754 = vmatprep.subr.bf16.mxu0 %v2439_v42 }
  0x6f   : > { %1786 = vmatprep.subr.bf16.mxu1 %v2442_v46 }
  0x71   : > { %1756 = vmatpush1.bf16.msra.mxu0 %v2447_v53 }
  0x72   : > { %1788 = vmatpush1.bf16.msra.mxu1 %v2451_v55  ;;  %1758 = vmatprep.subr.bf16.mxu0 %v2453_v56 }
  0x73   : > { %1790 = vmatprep.subr.bf16.mxu1 %v2456_v60 }
  0x75   : > { %1760 = vmatpush1.bf16.msra.mxu0 %v2459_v2 }
  0x76   : > { %1792 = vmatpush1.bf16.msra.mxu1 %v2464_v4  ;;  %1762 = vmatprep.subr.bf16.mxu0 %v2466_v5 }
  0x77   : > { %1794 = vmatprep.subr.bf16.mxu1 %v2469_v10 }
  0x79   : > { %1764 = vmatpush1.bf16.msra.mxu0 %v2476_v17 }
  0x7a   : > { %1796 = vmatpush1.bf16.msra.mxu1 %v2481_v18  ;;  %1766 = vmatprep.subr.bf16.mxu0 %v2483_v21 }
  0x7b   : > { %1798 = vmatprep.subr.bf16.mxu1 %v2486_v26 }
  0x7d   : > { %1768 = vmatpush1.bf16.msra.mxu0 %v2493_v36 }
  0x7e   : > { %1800 = vmatpush1.bf16.msra.mxu1 %v2498_v38  ;;  %1770 = vmatprep.subr.bf16.mxu0 %v2500_v39 }
  0x7f   : > { %1802 = vmatprep.subr.bf16.mxu1 %v2503_v45 }
  0x81   : > { %1772 = vmatpush1.bf16.msra.mxu0 %v2509_v52 }
  0x82   : > { %1804 = vmatpush1.bf16.msra.mxu1 %v2514_v54  ;;  %1774 = vmatprep.subr.bf16.mxu0 %v2516_v57 }
  0x83   : > { %1806 = vmatprep.subr.bf16.mxu1 %v2519_v61 }
  0x85   : > { %1776 = vmatpush1.bf16.msra.mxu0 %v2522_v0 }
  0x86   : > { %1808 = vmatpush1.bf16.msra.mxu1 %v2526_v1  ;;  %1810 = vmatprep.subr.bf16.mxu0 %v2415_v19 }
  0x87   : > { %1842 = vmatprep.subr.bf16.mxu1 %v2417_v20 }
 0x13b   : > { %v706_v22 = vpop.f32.mrb[0].mxu0 }
 0x13c   : > { %v1937_v23 = vadd.f32 %v706_v22, %v2570_v14  ;;  %v777_v25 = vpop.f32.mrb[0].mxu1  ;;  %v708_v27 = vpop.f32.mrb[1].mxu0 }
 0x13d   : > { %v1938_v29 = vadd.f32 %v708_v27, %v2572_v15  ;;  %v779_v30 = vpop.f32.mrb[1].mxu1  ;;  %v1945_v31 = vadd.f32 %v777_v25, %v2574_v16 }
 0x13e   : > { %2038 = vtanh.f32 %v1937_v23  ;;  %v1946_v40 = vadd.f32 %v779_v30, %v2579_v35 }
 0x13f   : > { %2040 = vtanh.f32 %v1938_v29 }
 0x140   : > { %2042 = vtanh.f32 %v1945_v31 }
 0x141   : > { %2044 = vtanh.f32 %v1946_v40 }
 0x148   : > { %v2039_v43 = vpop.eup %2038 }
 0x149   : > { %v790_v44 = vmul.f32 0.5, %v2039_v43  ;;  %v2041_v47 = vpop.eup %2040 }
 0x14a   : > { %v792_v49 = vmul.f32 0.5, %v2041_v47  ;;  %v2043_v50 = vpop.eup %2042 }
 0x14b   : > { %v791_v48 = vadd.f32 0.5, %v790_v44  ;;  %v2045_v3 = vpop.eup %2044 }
 0x14c   : > { %v793_v58 = vadd.f32 0.5, %v792_v49  ;;  %v794_v6 = vmul.f32 0.5, %v2045_v3 }
 0x14d   : > { %v797_v59 = vmul.f32 %v2043_v50, %v791_v48 }
 0x14e   : > { %v796_v62 = vmul.f32 %v793_v58, %v568_v51  ;;  %v795_v7 = vadd.f32 0.5, %v794_v6 }
 0x150   : > { %v2582_v63 = vadd.f32 %v797_v59, %v796_v62 }
 0x152   : > { %2046 = vtanh.f32 %v2582_v63 }
 0x15c   : > { %v2047_v8 = vpop.eup %2046 }
 0x15d   : > { %v800_v11 = vmul.f32 %v2047_v8, %v795_v7 }
 0x15f   : > { %801 = vst [vmem:[%s2379_s10] sm:$0xff] %v800_v11  ;;  %938 = vmatmul.mubr.f32.vlgmr.msra.gmra.mrb[2].mxu0 %v800_v11  ;;  %1009 = vmatmul.mubr.f32.vlgmr.msra.gmra.mrb[2].mxu1 %v800_v11 }
 0x160   : > { %1812 = vmatpush1.bf16.msra.mxu0 %v2420_v24  ;;  %1844 = vmatpush1.bf16.msra.mxu1 %v2424_v28 }
 0x161   : > { %1814 = vmatprep.subr.bf16.mxu0 %v2427_v32  ;;  %1846 = vmatprep.subr.bf16.mxu1 %v2429_v33 }
 0x162   : > { %1171 = vmatprep.mubr.f32.mxu0 %v2233_v9  ;;  %1242 = vmatprep.mubr.f32.mxu1 %v2233_v9 }
 0x164   : > { %1816 = vmatpush1.bf16.msra.mxu0 %v2433_v37  ;;  %1848 = vmatpush1.bf16.msra.mxu1 %v2437_v41 }
 0x165   : > { %1818 = vmatprep.subr.bf16.mxu0 %v2439_v42  ;;  %1850 = vmatprep.subr.bf16.mxu1 %v2442_v46 }
 0x168   : > { %1820 = vmatpush1.bf16.msra.mxu0 %v2447_v53  ;;  %1852 = vmatpush1.bf16.msra.mxu1 %v2451_v55 }
 0x169   : > { %1822 = vmatprep.subr.bf16.mxu0 %v2453_v56  ;;  %1854 = vmatprep.subr.bf16.mxu1 %v2456_v60 }
 0x16c   : > { %1824 = vmatpush1.bf16.msra.mxu0 %v2459_v2  ;;  %1856 = vmatpush1.bf16.msra.mxu1 %v2464_v4 }
 0x16d   : > { %1826 = vmatprep.subr.bf16.mxu0 %v2466_v5  ;;  %1858 = vmatprep.subr.bf16.mxu1 %v2469_v10 }
 0x170   : > { %1828 = vmatpush1.bf16.msra.mxu0 %v2476_v17  ;;  %1860 = vmatpush1.bf16.msra.mxu1 %v2481_v18 }
 0x171   : > { %1830 = vmatprep.subr.bf16.mxu0 %v2483_v21  ;;  %1862 = vmatprep.subr.bf16.mxu1 %v2486_v26 }
 0x174   : > { %1832 = vmatpush1.bf16.msra.mxu0 %v2493_v36  ;;  %1864 = vmatpush1.bf16.msra.mxu1 %v2498_v38 }
 0x175   : > { %1834 = vmatprep.subr.bf16.mxu0 %v2500_v39  ;;  %1866 = vmatprep.subr.bf16.mxu1 %v2503_v45 }
 0x178   : > { %1836 = vmatpush1.bf16.msra.mxu0 %v2509_v52  ;;  %1868 = vmatpush1.bf16.msra.mxu1 %v2514_v54 }
 0x179   : > { %1838 = vmatprep.subr.bf16.mxu0 %v2516_v57  ;;  %1870 = vmatprep.subr.bf16.mxu1 %v2519_v61 }
 0x17c   : > { %1840 = vmatpush1.bf16.msra.mxu0 %v2522_v0  ;;  %1872 = vmatpush1.bf16.msra.mxu1 %v2526_v1 }
 0x17d   : > { %1874 = vmatprep.subr.bf16.mxu0 %v2415_v19  ;;  %1906 = vmatprep.subr.bf16.mxu1 %v2417_v20 }
 0x232   : > { %v939_v12 = vpop.f32.mrb[2].mxu0  ;;  %v1010_v13 = vpop.f32.mrb[2].mxu1 }
 0x233   : > { %v1939_v22 = vadd.f32 %v939_v12, %v2570_v14  ;;  %v941_v23 = vpop.f32.mrb[3].mxu0  ;;  %v1012_v25 = vpop.f32.mrb[3].mxu1  ;;  %v1947_v29 = vadd.f32 %v1010_v13, %v2574_v16 }
 0x234   : > { %v1940_v27 = vadd.f32 %v941_v23, %v2572_v15  ;;  %v1948_v30 = vadd.f32 %v1012_v25, %v2579_v35 }
 0x235   : > { %2048 = vtanh.f32 %v1939_v22 }
 0x236   : > { %2050 = vtanh.f32 %v1940_v27 }
 0x237   : > { %2052 = vtanh.f32 %v1947_v29 }
 0x238   : > { %2054 = vtanh.f32 %v1948_v30 }
 0x23f   : > { %v2049_v31 = vpop.eup %2048 }
 0x240   : > { %v1023_v34 = vmul.f32 0.5, %v2049_v31  ;;  %v2051_v19 = vpop.eup %2050 }
 0x241   : > { %v1025_v40 = vmul.f32 0.5, %v2051_v19  ;;  %v2053_v43 = vpop.eup %2052 }
 0x242   : > { %v1024_v20 = vadd.f32 0.5, %v1023_v34  ;;  %v2055_v50 = vpop.eup %2054 }
 0x243   : > { %v1026_v44 = vadd.f32 0.5, %v1025_v40  ;;  %v1027_v51 = vmul.f32 0.5, %v2055_v50 }
 0x244   : > { %v1030_v47 = vmul.f32 %v2053_v43, %v1024_v20 }
 0x245   : > { %v1029_v48 = vmul.f32 %v1026_v44, %v2582_v63  ;;  %v1028_v58 = vadd.f32 0.5, %v1027_v51 }
 0x247   : > { %v1031_v49 = vadd.f32 %v1030_v47, %v1029_v48 }
 0x249   : > { %2056 = vtanh.f32 %v1031_v49 }
 0x253   : > { %v2057_v59 = vpop.eup %2056 }
 0x254   : > { %v1033_v62 = vmul.f32 %v2057_v59, %v1028_v58 }
 0x256   : > { %1660 = vst [vmem:[%s2379_s10 + $0x8] sm:$0xff] %v1033_v62  ;;  %1172 = vmatmul.mubr.f32.vlgmr.msra.gmra.mrb[4].mxu0 %v1033_v62  ;;  %1243 = vmatmul.mubr.f32.vlgmr.msra.gmra.mrb[4].mxu1 %v1033_v62 }
 0x257   : > { %1876 = vmatpush1.bf16.msra.mxu0 %v2420_v24  ;;  %1908 = vmatpush1.bf16.msra.mxu1 %v2424_v28 }
 0x258   : > { %1878 = vmatprep.subr.bf16.mxu0 %v2427_v32  ;;  %1910 = vmatprep.subr.bf16.mxu1 %v2429_v33 }
 0x259   : > { %1405 = vmatprep.mubr.f32.mxu0 %v2233_v9  ;;  %1476 = vmatprep.mubr.f32.mxu1 %v2233_v9 }
 0x25b   : > { %1880 = vmatpush1.bf16.msra.mxu0 %v2433_v37  ;;  %1912 = vmatpush1.bf16.msra.mxu1 %v2437_v41 }
 0x25c   : > { %1882 = vmatprep.subr.bf16.mxu0 %v2439_v42  ;;  %1914 = vmatprep.subr.bf16.mxu1 %v2442_v46 }
 0x25f   : > { %1884 = vmatpush1.bf16.msra.mxu0 %v2447_v53  ;;  %1916 = vmatpush1.bf16.msra.mxu1 %v2451_v55 }
 0x260   : > { %1886 = vmatprep.subr.bf16.mxu0 %v2453_v56  ;;  %1918 = vmatprep.subr.bf16.mxu1 %v2456_v60 }
 0x263   : > { %1888 = vmatpush1.bf16.msra.mxu0 %v2459_v2  ;;  %1920 = vmatpush1.bf16.msra.mxu1 %v2464_v4 }
 0x264   : > { %1890 = vmatprep.subr.bf16.mxu0 %v2466_v5  ;;  %1922 = vmatprep.subr.bf16.mxu1 %v2469_v10 }
 0x267   : > { %1892 = vmatpush1.bf16.msra.mxu0 %v2476_v17  ;;  %1924 = vmatpush1.bf16.msra.mxu1 %v2481_v18 }
 0x268   : > { %1894 = vmatprep.subr.bf16.mxu0 %v2483_v21  ;;  %1926 = vmatprep.subr.bf16.mxu1 %v2486_v26 }
 0x26b   : > { %1896 = vmatpush1.bf16.msra.mxu0 %v2493_v36  ;;  %1928 = vmatpush1.bf16.msra.mxu1 %v2498_v38 }
 0x26c   : > { %1898 = vmatprep.subr.bf16.mxu0 %v2500_v39  ;;  %1930 = vmatprep.subr.bf16.mxu1 %v2503_v45 }
 0x26f   : > { %1900 = vmatpush1.bf16.msra.mxu0 %v2509_v52  ;;  %1932 = vmatpush1.bf16.msra.mxu1 %v2514_v54 }
 0x270   : > { %1902 = vmatprep.subr.bf16.mxu0 %v2516_v57  ;;  %1934 = vmatprep.subr.bf16.mxu1 %v2519_v61 }
 0x273   : > { %1904 = vmatpush1.bf16.msra.mxu0 %v2522_v0  ;;  %1936 = vmatpush1.bf16.msra.mxu1 %v2526_v1 }
 0x329   : > { %v1173_v9 = vpop.f32.mrb[4].mxu0  ;;  %v1244_v24 = vpop.f32.mrb[4].mxu1 }
 0x32a   : > { %v1941_v28 = vadd.f32 %v1173_v9, %v2570_v14  ;;  %v1175_v32 = vpop.f32.mrb[5].mxu0  ;;  %v1246_v33 = vpop.f32.mrb[5].mxu1  ;;  %v1949_v41 = vadd.f32 %v1244_v24, %v2574_v16 }
 0x32b   : > { %v1942_v37 = vadd.f32 %v1175_v32, %v2572_v15  ;;  %v1950_v42 = vadd.f32 %v1246_v33, %v2579_v35 }
 0x32c   : > { %2058 = vtanh.f32 %v1941_v28 }
 0x32d   : > { %2060 = vtanh.f32 %v1942_v37 }
 0x32e   : > { %2062 = vtanh.f32 %v1949_v41 }
 0x32f   : > { %2064 = vtanh.f32 %v1950_v42 }
 0x336   : > { %v2059_v46 = vpop.eup %2058 }
 0x337   : > { %v1257_v53 = vmul.f32 0.5, %v2059_v46  ;;  %v2061_v55 = vpop.eup %2060 }
 0x338   : > { %v1259_v60 = vmul.f32 0.5, %v2061_v55  ;;  %v2063_v2 = vpop.eup %2062 }
 0x339   : > { %v1258_v56 = vadd.f32 0.5, %v1257_v53  ;;  %v2065_v18 = vpop.eup %2064 }
 0x33a   : > { %v1260_v4 = vadd.f32 0.5, %v1259_v60  ;;  %v1261_v21 = vmul.f32 0.5, %v2065_v18 }
 0x33b   : > { %v1264_v5 = vmul.f32 %v2063_v2, %v1258_v56 }
 0x33c   : > { %v1263_v10 = vmul.f32 %v1260_v4, %v1031_v49  ;;  %v1262_v26 = vadd.f32 0.5, %v1261_v21 }
 0x33e   : > { %v1265_v17 = vadd.f32 %v1264_v5, %v1263_v10 }
 0x340   : > { %2066 = vtanh.f32 %v1265_v17 }
 0x34a   : > { %v2067_v36 = vpop.eup %2066 }
 0x34b   : > { %v1267_v38 = vmul.f32 %v2067_v36, %v1262_v26 }
 0x34d   : > { %1661 = vst [vmem:[%s2379_s10 + $0x10] sm:$0xff] %v1267_v38  ;;  %1406 = vmatmul.mubr.f32.vlgmr.msra.gmra.mrb[6].mxu0 %v1267_v38  ;;  %1477 = vmatmul.mubr.f32.vlgmr.msra.gmra.mrb[6].mxu1 %v1267_v38 }
 0x420   : > { %v1407_v39 = vpop.f32.mrb[6].mxu0  ;;  %v1478_v45 = vpop.f32.mrb[6].mxu1 }
 0x421   : > { %v1943_v52 = vadd.f32 %v1407_v39, %v2570_v14  ;;  %v1409_v54 = vpop.f32.mrb[7].mxu0  ;;  %v1480_v57 = vpop.f32.mrb[7].mxu1  ;;  %v1951_v0 = vadd.f32 %v1478_v45, %v2574_v16 }
 0x422   : > { %v1944_v61 = vadd.f32 %v1409_v54, %v2572_v15  ;;  %v1952_v1 = vadd.f32 %v1480_v57, %v2579_v35 }
 0x423   : > { %2068 = vtanh.f32 %v1943_v52 }
 0x424   : > { %2070 = vtanh.f32 %v1944_v61 }
 0x425   : > { %2072 = vtanh.f32 %v1951_v0 }
 0x426   : > { %2074 = vtanh.f32 %v1952_v1 }
 0x42d   : > { %v2069_v63 = vpop.eup %2068 }
 0x42e   : > { %v1491_v3 = vmul.f32 0.5, %v2069_v63  ;;  %v2071_v6 = vpop.eup %2070 }
 0x42f   : > { %v1493_v8 = vmul.f32 0.5, %v2071_v6  ;;  %v2073_v14 = vpop.eup %2072 }
 0x430   : > { %v1492_v7 = vadd.f32 0.5, %v1491_v3  ;;  %v2075_v16 = vpop.eup %2074 }
 0x431   : > { %v1494_v11 = vadd.f32 0.5, %v1493_v8  ;;  %v1495_v22 = vmul.f32 0.5, %v2075_v16 }
 0x432   : > { %v1498_v12 = vmul.f32 %v2073_v14, %v1492_v7 }
 0x433   : > { %v1497_v13 = vmul.f32 %v1494_v11, %v1265_v17  ;;  %v1496_v35 = vadd.f32 0.5, %v1495_v22 }
 0x435   : > { %v1499_v15 = vadd.f32 %v1498_v12, %v1497_v13 }
 0x437   : > { %2076 = vtanh.f32 %v1499_v15  ;;  %1505 = vst [vmem:[#allocation4] sm:$0xff] %v1499_v15  ;;  %1507 = vst [vmem:[#allocation11] sm:$0xff] %v1499_v15 }
 0x441   : > { %v2077_v23 = vpop.eup %2076 }
 0x442   : > { %v1501_v25 = vmul.f32 %v2077_v23, %v1496_v35 }
 0x444   : > { %1662 = vst [vmem:[%s2379_s10 + $0x18] sm:$0xff] %v1501_v25  ;;  %1504 = vst [vmem:[#allocation3] sm:$0xff] %v1501_v25 }
 0x445   : > { %1506 = vst [vmem:[#allocation9] sm:$0xff] %v1501_v25 }
 0x446   : > { %2119 = shalt.err (!%p2116_p8)
}
 0x447   : > { %s2120_s26 = scalar_lea.hbm %s2774_s7, 128  ;;  %p2790_p0 = pmov %p2789_p10 }
 0x448   : > { %p2121_p12 = scmp.ne.s32.totalorder %s2774_s7, %s2120_s26  ;;  %p2126_p5 = scmp.lt.u32.totalorder %s2120_s26, %s2774_s7 }
 0x44a   : > { %p2122_p3 = pnand %p2121_p12, %p2790_p0 }
 0x44c   : > { %p2123_p2 = pneg %p2122_p3 }
 0x44e   : > { %p2128_p6 = pnand %p2126_p5, %p2123_p2 }
 0x450   : > { %2131 = shalt.err (!%p2128_p6)
}
 0x451   : > { %p2791_p9 = pmov %p2790_p0  ;;  %s2792_s23 = sand.u32 1, %s2220_s28  }
 0x452   : > { %s2699_s17 = scalar_lea.sflag [#allocation7], %s2792_s23  ;;  %s2132_s10 = scalar_lea.vmem %s2674_s18, 512 }
 0x453   : > { %1975 = dma.vmem_to_hbm [thread:$0]  (%p2791_p9), %s1537_s12, 128, %s2774_s7, [#allocation10]  }
 0x454   : > { %p2133_p10 = scmp.ne.s32.totalorder %s2674_s18, %s2132_s10  ;;  %p2793_p11 = scmp.ne.s32.totalorder %s2781_s15, 0 }
 0x455   : > { %s2236_s26 = smov [#allocation8]  }
 0x456   : > { %p2134_p13 = pnand %p2133_p10, %p2793_p11  ;;  %s2136_s13 = sshll.u32 %s2236_s26, 4  ;;  %s2137_s13 = int_to_ptr.vmem [resolvable:$false] %s2136_s13 }
 0x457   : > { %s2138_s21 = scalar_lea.vmem %s2137_s13, 1024  ;;  %p2139_p4 = scmp.lt.s32.totalorder %s2674_s18, %s2137_s13 }
 0x458   : > { %p2135_p1 = pneg %p2134_p13  ;;  %p2140_p7 = scmp.lt.s32.totalorder %s2138_s21, %s2132_s10 }
 0x45a   : > { %p2141_p8 = por %p2140_p7, %p2139_p4 }
 0x45c   : > { %p2142_p12 = pnand %p2141_p8, %p2135_p1 }
 0x45e   : > { %2145 = shalt.err (!%p2142_p12)
}
 0x45f   : > { %s2146_s12 = scalar_lea.hbm %s2672_s25, 512  ;;  %s2150_s19 = scalar_lea.hbm %s2773_s6, 1024 }
 0x460   : > { %p2147_p0 = scmp.ne.s32.totalorder %s2672_s25, %s2146_s12  ;;  %p2151_p5 = scmp.lt.u32.totalorder %s2672_s25, %s2773_s6 }
 0x461   : > { %p2152_p6 = scmp.lt.u32.totalorder %s2150_s19, %s2146_s12  ;;  %p2154_p10 = scmp.lt.u32.totalorder %s2146_s12, %s2672_s25 }
 0x462   : > { %p2148_p3 = pnand %p2147_p0, %p2793_p11 }
 0x463   : > { %p2153_p9 = por %p2152_p6, %p2151_p5 }
 0x464   : > { %p2149_p2 = pneg %p2148_p3 }
 0x465   : > { %p2155_p13 = por %p2154_p10, %p2153_p9 }
 0x467   : > { %p2156_p1 = pnand %p2155_p13, %p2149_p2 }
 0x469   : > { %2159 = shalt.err (!%p2156_p1)
}
 0x46a   : > { %s2237_s10 = smov 128   ;;  %s2238_s13 = smov 8  }
 0x46b   : > { %1973 = dma.vmem_to_hbm [thread:$0]  (%p2793_p11), %s2674_s18, 512, %s2672_s25, %s2699_s17, %s2237_s10, %s2237_s10, %s2238_s13  }
 0x46c   : > { %s2160_s21 = scalar_lea.vmem %s2677_s22, 128  ;;  %p2794_p7 = scmp.eq.s32.totalorder %s2305_s9, 1 }
 0x46d   : > { %p2161_p4 = scmp.ne.s32.totalorder %s2677_s22, %s2160_s21  ;;  %p2167_p0 = scmp.lt.s32.totalorder %s2677_s22, %s2677_s22 }
 0x46e   : > { %p2168_p3 = scmp.lt.s32.totalorder %s2160_s21, %s2160_s21 }
 0x46f   : > { %p2162_p8 = pnand %p2161_p4, %p2794_p7 }
 0x470   : > { %p2169_p2 = por %p2168_p3, %p2167_p0 }
 0x471   : > { %p2163_p12 = pneg %p2162_p8 }
 0x473   : > { %p2170_p5 = pnand %p2169_p2, %p2163_p12 }
 0x475   : > { %2173 = shalt.err (!%p2170_p5)
}
 0x476   : > { %s2174_s20 = scalar_lea.hbm %s2775_s8, 128  ;;  %p2795_p6 = pmov %p2794_p7 }
 0x477   : > { %p2175_p11 = scmp.ne.s32.totalorder %s2775_s8, %s2174_s20  ;;  %p2180_p13 = scmp.lt.u32.totalorder %s2174_s20, %s2775_s8 }
 0x479   : > { %p2176_p9 = pnand %p2175_p11, %p2795_p6 }
 0x47b   : > { %p2177_p10 = pneg %p2176_p9 }
 0x47d   : > { %p2182_p1 = pnand %p2180_p13, %p2177_p10 }
 0x47f   : > { %2185 = shalt.err (!%p2182_p1)
}
 0x480   : > { %p2796_p4 = pmov %p2795_p6 }
 0x482   : > { %1977 = dma.vmem_to_hbm [thread:$0]  (%p2796_p4), %s2677_s22, 128, %s2775_s8, [#allocation10]  }
 0x483   : > { %p2797_p7 = pmov %p2796_p4 }
 0x484   : > { %p2798_p8 = pmov %p2796_p4 }
 0x485   : > { %2207 = dma.done.wait (%p2797_p7), [#allocation10], 256  }
 0x486   : > { %2209 = vsyncadd (%p2798_p8), [#allocation10], 4294967040 }
 0x487 PF: > { %p1997_p12 = scmp.ge.s32.totalorder %s2228_s30, 2  ;;  %s1567_s26 = sand.u32 1, %s2216_s27  }
 0x488   : > { %p2799_p0 = scmp.ne.s32.totalorder %s2782_s16, 0  ;;  %s1568_s10 = scalar_lea.sflag [#allocation7], %s1567_s26 }
 0x48a   : > { %p1988_p3 = pnand %p1997_p12, %p2799_p0 }
 0x48c   : > { %2211 = dma.done.wait (!%p1988_p3), %s1568_s10, 512  }
 0x48d   : > { %2213 = vsyncadd (!%p1988_p3), %s1568_s10, 4294966784  ;;  %p21_p2 = scmp.ge.s32.totalorder %s2309_s11, 4   ;;  %s2800_s27 = smov %s2220_s28 }
 0x48e   : > { %s2801_s28 = smov %s2224_s29  ;;  %s2802_s29 = smov %s2320_s14 }
 0x48f   : > { %s2803_s30 = smov %s2309_s11  ;;  %23 = sbr.rel (!%p21_p2) target bundleno = 5 (0x5), region = 111 }
 0x496   :  { %1573 = vsyncpa [#allocation6], 1 }
 0x497   :  { %1575 = vsyncpa [#allocation6 + $0x1], 1 }
 0x498   :  { %1576 = vsyncpa [#allocation7], 1 }
 0x499   :  { %1578 = vsyncpa [#allocation7 + $0x1], 1 }
 0x49a   :  { %1579 = vsyncpa [#allocation10], 1 }

</bundles_post_ra>
